<compile_context>
chip_gen: v6e
topology: v6e:2x2x1
jax: 0.10.0
libtpu: 0.0.40
codegen_flags: <defaults>
</compile_context>

<pallas_src>
import functools

import jax
import jax.numpy as jnp
from jax import lax
from jax.experimental import pallas as pl
from jax.experimental.pallas import tpu as pltpu

_LANE = 128
_SUBLANE = 8
_BLOCK_ELEMS = _SUBLANE * _LANE  # 1024


def _select_tiling():
    """(max_tile_rows, max_splits) chosen per chip generation."""
    try:
        kind = jax.devices()[0].device_kind.lower()
    except Exception:  # pragma: no cover - defensive; fall back to safe defaults
        kind = ""
    if "v7" in kind or "tpu7" in kind:
        # 8192 rows = 4 MiB/f32 tile; 2 inputs x 2 buffers = 16 MiB, inside
        # v7x's 32 MiB scoped default.  2 TensorCores -> 2-way parallel split.
        return 8192, 2
    if "v4" in kind or "v5p" in kind or "v5 p" in kind:
        # Megacore chips: keep the 2-way split, 2 MiB tiles.
        return 4096, 2
    # v5e / v6e (single TensorCore): 4096 rows = 2 MiB/f32 tile; 2 x 2 buffers
    # = 8 MiB, safely under v5e's 16 MiB scoped-VMEM default.
    return 4096, 1


def _vae_loss_kernel(recon_ref, x_ref, mu_ref, logvar_ref, out_ref, *,
                     tile_rows, tiles_per_split, valid_rows, needs_mask):
    c = pl.program_id(0)   # per-core split axis ("parallel")
    i = pl.program_id(1)   # row-tile / reduction axis ("arbitrary")

    # Zero this split's resident partial-sum block at the start of its pass.
    @pl.when(i == 0)
    def _init():
        out_ref[...] = jnp.zeros_like(out_ref)

    # ---- MSE partial for this tile (native dtype in HBM, f32 math in VMEM).
    r = recon_ref[...].astype(jnp.float32)
    t = x_ref[...].astype(jnp.float32)
    diff = r - t
    sq = diff * diff

    def _block_sum(a):
        # (tile_rows, 128) -> (tile_rows//8, 8, 128) -> (8, 128).
        # Splitting the sublane axis is a pure vreg relabeling (no layout
        # copy); the axis-0 sum is plain VPU adds of (8,128) vregs.
        return jnp.sum(a.reshape(tile_rows // _SUBLANE, _SUBLANE, _LANE),
                       axis=0)

    if needs_mask:
        g = c * tiles_per_split + i
        tile_end = (g + 1) * tile_rows

        @pl.when(tile_end <= valid_rows)
        def _full_tile():
            out_ref[...] += _block_sum(sq)

        @pl.when(tile_end > valid_rows)
        def _edge_tile():
            # Ragged final tile (Pallas-padded rows hold garbage VMEM) and/or
            # a clamped duplicate tile on the second split (g >= n_tiles):
            # zero every row past the real row count.  jnp.where does not
            # propagate NaN/Inf from the unselected branch.
            row = g * tile_rows + lax.broadcasted_iota(jnp.int32, sq.shape, 0)
            out_ref[...] += _block_sum(jnp.where(row < valid_rows, sq, 0.0))
    else:
        out_ref[...] += _block_sum(sq)

    # ---- KLD: tiny resident (padded) tensors, computed exactly once.
    @pl.when(jnp.logical_and(c == 0, i == 0))
    def _kld():
        mu = mu_ref[...]
        lv = logvar_ref[...]
        kld = -0.5 * jnp.sum(1.0 + lv - mu * mu - jnp.exp(lv))
        sub = lax.broadcasted_iota(jnp.int32, out_ref.shape, 0)
        lane = lax.broadcasted_iota(jnp.int32, out_ref.shape, 1)
        out_ref[...] += jnp.where(
            jnp.logical_and(sub == 0, lane == 0), kld, 0.0)


def _split_body_tail(a):
    """Split into a copy-free (rows, 128) lane-dense body (rows % 8 == 0)
    and a small (< 1024-element) tail handled in the wrapper."""
    flat = a.reshape(-1)
    n = flat.shape[0]
    body_n = (n // _BLOCK_ELEMS) * _BLOCK_ELEMS
    if body_n == 0:
        # Tiny input: one zero-padded (8, 128) block.  Padding both recon and
        # x with zeros contributes (0 - 0)^2 = 0 to the MSE, so it is exact,
        # and the copy is negligible at < 1024 elements.
        padded = jnp.zeros((_BLOCK_ELEMS,), flat.dtype).at[:n].set(flat)
        return padded.reshape(_SUBLANE, _LANE), None
    body = flat[:body_n].reshape(-1, _LANE)
    tail = flat[body_n:] if body_n < n else None
    return body, tail


def _pad_small_to_slab(a):
    """Zero-pad a tiny tensor (mu / logvar) into an (8k, 128) f32 slab.

    Zeros contribute 1 + 0 - 0 - exp(0) = 0 to the KLD sum, so padding is
    exact.
    """
    flat = a.reshape(-1).astype(jnp.float32)
    n = flat.shape[0]
    rows = -(-n // _LANE)
    rows = -(-rows // _SUBLANE) * _SUBLANE
    padded = jnp.zeros((rows * _LANE,), jnp.float32).at[:n].set(flat)
    return padded.reshape(rows, _LANE)


def vae_loss(recon_x, x, mu, logvar):
    assert recon_x.shape == x.shape

    r_body, r_tail = _split_body_tail(recon_x)
    x_body, x_tail = _split_body_tail(x)
    m2 = _pad_small_to_slab(mu)
    l2 = _pad_small_to_slab(logvar)

    rows = r_body.shape[0]                       # always a multiple of 8
    max_tile_rows, max_splits = _select_tiling()
    tile_rows = rows if rows <= max_tile_rows else max_tile_rows
    n_tiles = -(-rows // tile_rows)

    # Split the row-tile range across the chip's TensorCores (2 on v7x /
    # megacore chips, 1 elsewhere) so each core drives its own DMA pipeline.
    n_splits = max_splits if n_tiles >= 2 else 1
    tiles_per_split = -(-n_tiles // n_splits)
    # Masking needed only when virtual tiles overshoot the real row count
    # (ragged final tile and/or odd tile count across the splits).
    needs_mask = n_splits * tiles_per_split * tile_rows > rows

    def data_map(c, i):
        g = c * tiles_per_split + i
        return (jnp.minimum(g, n_tiles - 1), 0)   # clamp; masked in-kernel

    kernel = functools.partial(
        _vae_loss_kernel,
        tile_rows=tile_rows,
        tiles_per_split=tiles_per_split,
        valid_rows=rows,
        needs_mask=needs_mask,
    )

    out = pl.pallas_call(
        kernel,
        out_shape=jax.ShapeDtypeStruct((n_splits * _SUBLANE, _LANE),
                                       jnp.float32),
        grid_spec=pltpu.PrefetchScalarGridSpec(
            num_scalar_prefetch=0,
            grid=(n_splits, tiles_per_split),
            in_specs=[
                pl.BlockSpec((tile_rows, _LANE), data_map),    # recon tiles
                pl.BlockSpec((tile_rows, _LANE), data_map),    # x tiles
                pl.BlockSpec(m2.shape, lambda c, i: (0, 0)),   # mu (resident)
                pl.BlockSpec(l2.shape, lambda c, i: (0, 0)),   # logvar (res.)
            ],
            out_specs=pl.BlockSpec((_SUBLANE, _LANE), lambda c, i: (c, 0)),
        ),
        compiler_params=pltpu.CompilerParams(
            dimension_semantics=("parallel", "arbitrary")),
    )(r_body, x_body, m2, l2)

    # Only a handful of entries are non-zero; summing the tiny
    # (n_splits*8, 128) partial slab is negligible.
    loss = jnp.sum(out)

    # Ragged (< 1024-element) tail handled outside the kernel: avoids a
    # full-array jnp.pad copy (which would double HBM traffic for that input).
    if r_tail is not None:
        d = r_tail.astype(jnp.float32) - x_tail.astype(jnp.float32)
        loss = loss + jnp.sum(d * d)

    return loss


if __name__ == "__main__":
    # Small shapes consistent with the VAE forward:
    #   recon_x, x : (B, C, H, W) images      -> (2, 4, 16, 16)
    #   mu, logvar : (B, Z) latent statistics -> (2, 32)
    B, C, H, W, Z = 2, 4, 16, 16, 32
    key = jax.random.PRNGKey(0)
    k1, k2, k3, k4 = jax.random.split(key, 4)

    x = jax.random.uniform(k1, (B, C, H, W), jnp.float32)
    recon_x = jax.random.uniform(k2, (B, C, H, W), jnp.float32)
    mu = jax.random.normal(k3, (B, Z), jnp.float32)
    logvar = 0.1 * jax.random.normal(k4, (B, Z), jnp.float32)

    loss_fn = jax.jit(vae_loss)
    loss = jax.block_until_ready(loss_fn(recon_x, x, mu, logvar))

    # Pure-JAX reference for a correctness check.
    mse_ref = jnp.sum((recon_x - x) ** 2)
    kld_ref = -0.5 * jnp.sum(1.0 + logvar - mu ** 2 - jnp.exp(logvar))
    ref = mse_ref + kld_ref

    assert jnp.allclose(loss, ref, rtol=1e-5, atol=1e-4), (loss, ref)
    print("KERNEL_OK")
</pallas_src>

<mosaic_0001>
module attributes {stable_mosaic.version = 11 : i64} {
  func.func @_vae_loss_kernel(%arg0: i32, %arg1: i32, %arg2: memref<16x128xf32, #tpu.memory_space<vmem>>, %arg3: memref<16x128xf32, #tpu.memory_space<vmem>>, %arg4: memref<8x128xf32, #tpu.memory_space<vmem>>, %arg5: memref<8x128xf32, #tpu.memory_space<vmem>>, %arg6: memref<8x128xf32, #tpu.memory_space<vmem>>) attributes {dimension_semantics = [#tpu.dimension_semantics<parallel>, #tpu.dimension_semantics<arbitrary>], iteration_bounds = array<i64: 1, 1>, scalar_prefetch = 0 : i64, scratch_operands = 0 : i64, tpu.core_type = #tpu.core_type<tc>, window_params = [{transform_indices = @transform_0, window_bounds = array<i64: 16, 128>}, {transform_indices = @transform_1, window_bounds = array<i64: 16, 128>}, {pipeline_mode = #tpu.pipeline_mode<synchronous>, transform_indices = @transform_2, window_bounds = array<i64: 8, 128>}, {pipeline_mode = #tpu.pipeline_mode<synchronous>, transform_indices = @transform_3, window_bounds = array<i64: 8, 128>}, {transform_indices = @transform_4, window_bounds = array<i64: 8, 128>}]} {
    %c0_i32 = arith.constant 0 : i32
    %0 = arith.cmpi eq, %arg1, %c0_i32 : i32
    %1 = arith.extui %0 : i1 to i32
    %c0_i32_0 = arith.constant 0 : i32
    %2 = arith.cmpi ne, %1, %c0_i32_0 : i32
    scf.if %2 {
      %cst_11 = arith.constant 0.000000e+00 : f32
      %17 = vector.broadcast %cst_11 : f32 to vector<8x128xf32>
      %c0_12 = arith.constant 0 : index
      %c0_13 = arith.constant 0 : index
      %18 = vector.load %arg6[%c0_12, %c0_13] : memref<8x128xf32, #tpu.memory_space<vmem>>, vector<8x128xf32>
      tpu.vector_store %arg6[%c0_12, %c0_13], %17 {strides = array<i32>} : memref<8x128xf32, #tpu.memory_space<vmem>>, vector<8x128xf32>,
    } else {
    }
    %c0 = arith.constant 0 : index
    %c0_1 = arith.constant 0 : index
    %3 = vector.load %arg2[%c0, %c0_1] : memref<16x128xf32, #tpu.memory_space<vmem>>, vector<16x128xf32>
    %c0_2 = arith.constant 0 : index
    %c0_3 = arith.constant 0 : index
    %4 = vector.load %arg3[%c0_2, %c0_3] : memref<16x128xf32, #tpu.memory_space<vmem>>, vector<16x128xf32>
    %5 = arith.subf %3, %4 : vector<16x128xf32>
    %6 = arith.mulf %5, %5 : vector<16x128xf32>
    %c0_4 = arith.constant 0 : index
    %c0_5 = arith.constant 0 : index
    %7 = vector.load %arg6[%c0_4, %c0_5] : memref<8x128xf32, #tpu.memory_space<vmem>>, vector<8x128xf32>
    %8 = vector.shape_cast %6 : vector<16x128xf32> to vector<2x8x128xf32>
    %cst = arith.constant dense<0.000000e+00> : vector<8x128xf32>
    %9 = vector.multi_reduction <add>, %8, %cst [0] : vector<2x8x128xf32> to vector<8x128xf32>
    %10 = arith.addf %7, %9 : vector<8x128xf32>
    %c0_6 = arith.constant 0 : index
    %c0_7 = arith.constant 0 : index
    %11 = vector.load %arg6[%c0_6, %c0_7] : memref<8x128xf32, #tpu.memory_space<vmem>>, vector<8x128xf32>
    tpu.vector_store %arg6[%c0_6, %c0_7], %10 {strides = array<i32>} : memref<8x128xf32, #tpu.memory_space<vmem>>, vector<8x128xf32>,
    %c0_i32_8 = arith.constant 0 : i32
    %12 = arith.cmpi eq, %arg0, %c0_i32_8 : i32
    %c0_i32_9 = arith.constant 0 : i32
    %13 = arith.cmpi eq, %arg1, %c0_i32_9 : i32
    %14 = arith.andi %12, %13 : i1
    %15 = arith.extui %14 : i1 to i32
    %c0_i32_10 = arith.constant 0 : i32
    %16 = arith.cmpi ne, %15, %c0_i32_10 : i32
    scf.if %16 {
      %c0_11 = arith.constant 0 : index
      %c0_12 = arith.constant 0 : index
      %17 = vector.load %arg4[%c0_11, %c0_12] : memref<8x128xf32, #tpu.memory_space<vmem>>, vector<8x128xf32>
      %c0_13 = arith.constant 0 : index
      %c0_14 = arith.constant 0 : index
      %18 = vector.load %arg5[%c0_13, %c0_14] : memref<8x128xf32, #tpu.memory_space<vmem>>, vector<8x128xf32>
      %cst_15 = arith.constant 1.000000e+00 : f32
      %19 = vector.broadcast %cst_15 : f32 to vector<8x128xf32>
      %20 = arith.addf %19, %18 : vector<8x128xf32>
      %21 = arith.mulf %17, %17 : vector<8x128xf32>
      %22 = arith.subf %20, %21 : vector<8x128xf32>
      %23 = math.exp %18 : vector<8x128xf32>
      %24 = arith.subf %22, %23 : vector<8x128xf32>
      %25 = vector.shape_cast %24 : vector<8x128xf32> to vector<1x8x128xf32>
      %cst_16 = arith.constant dense<0.000000e+00> : vector<1xf32>
      %26 = vector.multi_reduction <add>, %25, %cst_16 [1, 2] : vector<1x8x128xf32> to vector<1xf32>
      %27 = vector.shape_cast %26 : vector<1xf32> to vector<1x1x1xf32>
      %28 = vector.extract %27[0, 0, 0] : f32 from vector<1x1x1xf32>
      %cst_17 = arith.constant -5.000000e-01 : f32
      %29 = arith.mulf %cst_17, %28 : f32
      %30 = tpu.iota {dimensions = array<i32: 0>} : vector<8x128xi32>
      %31 = tpu.iota {dimensions = array<i32: 1>} : vector<8x128xi32>
      %c0_18 = arith.constant 0 : index
      %c0_19 = arith.constant 0 : index
      %32 = vector.load %arg6[%c0_18, %c0_19] : memref<8x128xf32, #tpu.memory_space<vmem>>, vector<8x128xf32>
      %c0_i32_20 = arith.constant 0 : i32
      %33 = vector.broadcast %c0_i32_20 : i32 to vector<8x128xi32>
      %34 = arith.cmpi eq, %30, %33 : vector<8x128xi32>
      %c0_i32_21 = arith.constant 0 : i32
      %35 = vector.broadcast %c0_i32_21 : i32 to vector<8x128xi32>
      %36 = arith.cmpi eq, %31, %35 : vector<8x128xi32>
      %37 = arith.andi %34, %36 : vector<8x128xi1>
      %cst_22 = arith.constant 0.000000e+00 : f32
      %38 = vector.broadcast %29 : f32 to vector<8x128xf32>
      %39 = vector.broadcast %cst_22 : f32 to vector<8x128xf32>
      %40 = arith.select %37, %38, %39 : vector<8x128xi1>, vector<8x128xf32>
      %41 = arith.addf %32, %40 : vector<8x128xf32>
      %c0_23 = arith.constant 0 : index
      %c0_24 = arith.constant 0 : index
      %42 = vector.load %arg6[%c0_23, %c0_24] : memref<8x128xf32, #tpu.memory_space<vmem>>, vector<8x128xf32>
      tpu.vector_store %arg6[%c0_23, %c0_24], %41 {strides = array<i32>} : memref<8x128xf32, #tpu.memory_space<vmem>>, vector<8x128xf32>,
    } else {
    }
    return
  }
  func.func @transform_0(%arg0: i32, %arg1: i32) -> (i32, i32) {
    %c1_i32 = arith.constant 1 : i32
    %0 = arith.muli %arg0, %c1_i32 : i32
    %1 = arith.addi %0, %arg1 : i32
    %c0_i32 = arith.constant 0 : i32
    %2 = arith.minsi %1, %c0_i32 : i32
    %c0_i32_0 = arith.constant 0 : i32
    %c0_i32_1 = arith.constant 0 : i32
    return %2, %c0_i32_0 : i32, i32
  }
  func.func @transform_1(%arg0: i32, %arg1: i32) -> (i32, i32) {
    %c1_i32 = arith.constant 1 : i32
    %0 = arith.muli %arg0, %c1_i32 : i32
    %1 = arith.addi %0, %arg1 : i32
    %c0_i32 = arith.constant 0 : i32
    %2 = arith.minsi %1, %c0_i32 : i32
    %c0_i32_0 = arith.constant 0 : i32
    %c0_i32_1 = arith.constant 0 : i32
    return %2, %c0_i32_0 : i32, i32
  }
  func.func @transform_2(%arg0: i32, %arg1: i32) -> (i32, i32) {
    %c0_i32 = arith.constant 0 : i32
    %c0_i32_0 = arith.constant 0 : i32
    %c0_i32_1 = arith.constant 0 : i32
    return %c0_i32, %c0_i32_0 : i32, i32
  }
  func.func @transform_3(%arg0: i32, %arg1: i32) -> (i32, i32) {
    %c0_i32 = arith.constant 0 : i32
    %c0_i32_0 = arith.constant 0 : i32
    %c0_i32_1 = arith.constant 0 : i32
    return %c0_i32, %c0_i32_0 : i32, i32
  }
  func.func @transform_4(%arg0: i32, %arg1: i32) -> (i32, i32) {
    %c0_i32 = arith.constant 0 : i32
    %c0_i32_0 = arith.constant 0 : i32
    return %arg0, %c0_i32 : i32, i32
  }
}

</mosaic_0001>

<bundles_post_ra>
// kernel: vae_loss.1
= control target key start
LH: loop header
LB: loop body
LE: loop exit
PB: predicated region body
PF: predicated region fallthrough
CT: control target
= control target key end

     0   :  { %v121_v21 = vlaneseq  ;;  %s200_s3 = inlined_call_operand.vmem [shape: f32[8,128], index: 3, kind: input, shape index: {}]   ;;  %s201_s2 = inlined_call_operand.vmem [shape: f32[8,128], index: 2, kind: input, shape index: {}]   ;;  %s202_s0 = inlined_call_operand.vmem [shape: f32[16,128], index: 0, kind: input, shape index: {}]   ;;  %s203_s1 = inlined_call_operand.vmem [shape: f32[16,128], index: 1, kind: input, shape index: {}]   ;;  %s204_s4 = inlined_call_operand.vmem [shape: f32[8,128], index: 4, kind: output, shape index: {}]  }
   0x1   :  { %v104_v0 = vld [vmem:[%s200_s3] sm:$0xff]  ;;  %v87_v16 = vld [vmem:[%s202_s0 + $0x8] sm:$0xff] }
   0x2   :  { %v108_v1 = vmul.f32 1.442695, %v104_v0  ;;  %v103_v2 = vld [vmem:[%s201_s2] sm:$0xff]  ;;  %v105_v3 = vadd.f32 1.0, %v104_v0  ;;  %v89_v18 = vld [vmem:[%s203_s1 + $0x8] sm:$0xff]  ;;  %v122_v24 = vshrl.u32 %v121_v21, 7 }
   0x3   :  { %v106_v4 = vmul.f32 %v103_v2, %v103_v2  ;;  %v86_v15 = vld [vmem:[%s202_s0] sm:$0xff]  ;;  %v91_v20 = vsub.f32 %v87_v16, %v89_v18  ;;  %v124_v25 = vand.u32 127, %v121_v21 }
   0x4   :  { %152 = vpow2.f32 %v108_v1  ;;  %v88_v17 = vld [vmem:[%s203_s1] sm:$0xff]  ;;  %vm126_vm0 = vcmp.eq.s32.totalorder %v122_v24, 0 }
   0x5   :  { %v107_v5 = vsub.f32 %v105_v3, %v106_v4  ;;  %v90_v19 = vsub.f32 %v86_v15, %v88_v17  ;;  %v93_v23 = vmul.f32 %v91_v20, %v91_v20  ;;  %vm127_vm1 = vcmp.eq.s32.totalorder %v124_v25, 0 }
   0x6   :  { %vm128_vm2 = vmand %vm126_vm0, %vm127_vm1 }
   0x7   :  { %v92_v22 = vmul.f32 %v90_v19, %v90_v19 }
   0x9   :  { %v95_v26 = vadd.f32 %v93_v23, %v92_v22 }
  0x11   :  { %v153_v6 = vpop.eup %152 }
  0x12   :  { %v110_v7 = vsub.f32 %v107_v5, %v153_v6 }
  0x14   :  { %111 = vadd.xlane.f32.xlu0 %v110_v7 }
  0x9d   :  { %v112_v8 = vpop.xlane.xlu0 %111 }
  0x9e   :  { %v113_v9 = vrot.slane %v112_v8, 4 }
  0xa0   :  { %v114_v10 = vadd.f32 %v113_v9, %v112_v8 }
  0xa2   :  { %v115_v11 = vrot.slane %v114_v10, 2 }
  0xa4   :  { %v116_v12 = vadd.f32 %v115_v11, %v114_v10 }
  0xa6   :  { %v117_v13 = vrot.slane %v116_v12, 1 }
  0xa8   :  { %v118_v14 = vadd.f32 %v117_v13, %v116_v12 }
  0xaa   :  { %149 = vpush %v118_v14 }
  0xdb   :  { %s150_s25 = spop %149 }
  0xdc   :  { %s120_s0 = smul.f32 -0.5, %s150_s25 }
  0xde   :  { %v129_v27 = vstv %s120_s0 }
  0xdf   :  { %v130_v28 = vsel %vm128_vm2, %v129_v27, 0.0 }
  0xe0   :  { %v131_v29 = vadd.f32 %v130_v28, %v95_v26 }
  0xe2   :  { %132 = vst [vmem:[%s204_s4] sm:$0xff] %v131_v29 }

</bundles_post_ra>
